<compile_context>
chip_gen: v7x
topology: tpu7x:2x2x1
jax: 0.10.0
libtpu: 0.0.40
codegen_flags: <defaults>
</compile_context>

<pallas_src>
import functools

import jax
import jax.numpy as jnp
from jax.experimental import pallas as pl
from jax.experimental.pallas import tpu as pltpu


def _focal_loss_kernel(logits_ref, tgt_ref, out_f_ref, out_w_ref, acc_f, acc_w,
                       *, gamma: float, rows_total: int, tile_rows: int,
                       tiles_per_part: int):
    p = pl.program_id(0)          # partition (TensorCore on v7x)
    i = pl.program_id(1)          # row-tile within partition (reduction axis)

    @pl.when(i == 0)
    def _():
        acc_f[...] = jnp.zeros_like(acc_f)
        acc_w[...] = jnp.zeros_like(acc_w)

    logits = logits_ref[...].astype(jnp.float32)     # [TM, C] f32 (cast in VMEM)
    tgt = tgt_ref[...]                               # [TM, 1] i32
    tm, c = logits.shape

    # One-hot gather of the target-class logit (out_target).
    col_ids = jax.lax.broadcasted_iota(jnp.int32, (tm, c), 1)
    onehot = col_ids == tgt                                       # [TM, C]
    tgt_logit = jnp.sum(jnp.where(onehot, logits, 0.0),
                        axis=-1, keepdims=True)                   # [TM, 1]

    # Cross-entropy (weight=None, reduction='none'): logsumexp - target logit.
    row_max = jnp.max(logits, axis=-1, keepdims=True)             # [TM, 1]
    sum_exp = jnp.sum(jnp.exp(logits - row_max), axis=-1, keepdims=True)
    ce = jnp.log(sum_exp) + row_max - tgt_logit                   # [TM, 1]

    # Focal weighting on sigmoid(target logit).  Integer gamma stays on the
    # VPU (jnp.power with a float exponent would cost exp+log on the EUP).
    probs = jax.nn.sigmoid(tgt_logit)                             # [TM, 1]
    omp = 1.0 - probs
    g = float(gamma)
    if g == 2.0:
        focal_w = omp * omp
    elif g.is_integer() and g >= 0.0:
        focal_w = jax.lax.integer_pow(omp, int(g))
    else:
        focal_w = jnp.power(omp, g)
    focal = focal_w * ce                                          # [TM, 1]

    # Mask rows past the end of the array: covers the ragged last tile AND the
    # fully out-of-range duplicate blocks created by the clamped index_map.
    # (Mask is applied to BOTH terms before accumulation so garbage/NaN from
    # the padded DMA rows never reaches the sums.)
    row0 = (p * tiles_per_part + i) * tile_rows
    row_ids = row0 + jax.lax.broadcasted_iota(jnp.int32, (tm, 1), 0)
    valid = row_ids < rows_total
    focal = jnp.where(valid, focal, 0.0)
    focal_w = jnp.where(valid, focal_w, 0.0)

    # Elementwise running accumulators (no per-step cross-sublane reduce).
    acc_f[...] += focal
    acc_w[...] += focal_w

    # Epilogue: one XLU reduction per partition; the divide lives in the wrapper.
    @pl.when(i == pl.num_programs(1) - 1)
    def _():
        out_f_ref[...] = jnp.sum(acc_f[...], axis=0, keepdims=True)
        out_w_ref[...] = jnp.sum(acc_w[...], axis=0, keepdims=True)


def _choose_tile_rows(n: int, c: int, itemsize: int, budget_bytes: int) -> int:
    """Row tile from a VMEM budget on the f32 working tile (also bounds the
    native-dtype DMA tile since itemsize <= 4).  No artificial row cap."""
    rows = max(8, budget_bytes // (c * 4))
    if rows >= n:
        return n                                  # single tile: block == full dims
    align = max(8, 32 // max(1, itemsize))        # 8 (f32) / 16 (bf16) / 32 (i8)
    return max(align, (rows // align) * align)


def focal_loss_pallas(output, target, gamma: float = 2.0, *,
                      tile_rows: int | None = None,
                      tile_budget_bytes: int = 2 * 1024 * 1024,
                      num_partitions: int = 2):
    """output: [N, C] logits (any float dtype, streamed as-is),
    target: [N] int class ids -> scalar f32 loss (reduction='mean')."""
    n, c = output.shape
    itemsize = jnp.dtype(output.dtype).itemsize
    tgt2d = target.astype(jnp.int32).reshape(n, 1)

    tm = tile_rows if tile_rows is not None else _choose_tile_rows(
        n, c, itemsize, tile_budget_bytes)
    tm = min(tm, n)
    num_tiles = pl.cdiv(n, tm)
    parts = max(1, min(num_partitions, num_tiles))      # 2-way split for v7x TCs
    tiles_per_part = pl.cdiv(num_tiles, parts)

    def tile_idx(p, i):
        # Clamp so a partition's trailing (empty) blocks never DMA from beyond
        # the array; their rows are fully masked inside the kernel.
        return jnp.minimum(p * tiles_per_part + i, num_tiles - 1)

    cost = pl.CostEstimate(
        flops=8 * n * c,
        transcendentals=n * c + 3 * n,
        bytes_accessed=n * c * itemsize + n * 4 + 8 * parts)

    out_f, out_w = pl.pallas_call(
        functools.partial(_focal_loss_kernel, gamma=gamma, rows_total=n,
                          tile_rows=tm, tiles_per_part=tiles_per_part),
        out_shape=(jax.ShapeDtypeStruct((parts, 1), jnp.float32),
                   jax.ShapeDtypeStruct((parts, 1), jnp.float32)),
        grid=(parts, tiles_per_part),
        in_specs=[
            pl.BlockSpec((tm, c), lambda p, i: (tile_idx(p, i), 0)),   # logits tile
            pl.BlockSpec((tm, 1), lambda p, i: (tile_idx(p, i), 0)),   # target rows
        ],
        out_specs=(
            pl.BlockSpec((1, 1), lambda p, i: (p, 0)),   # per-partition sum(focal)
            pl.BlockSpec((1, 1), lambda p, i: (p, 0)),   # per-partition sum(focal_w)
        ),
        scratch_shapes=[pltpu.VMEM((tm, 1), jnp.float32),   # running focal
                        pltpu.VMEM((tm, 1), jnp.float32)],  # running focal_w
        compiler_params=pltpu.CompilerParams(
            dimension_semantics=("parallel", "arbitrary"),
            vmem_limit_bytes=40 * 1024 * 1024),
        cost_estimate=cost,
    )(output, tgt2d)

    # reduction='mean'  ->  sum(focal) / sum(focal_w); tiny combine outside.
    # (If all target probs ~1, sum(focal_w)->0 and this is Inf/NaN, exactly as
    # in the PyTorch reference formula.)
    return jnp.sum(out_f) / jnp.sum(out_w)


def focal_loss_ref(output, target, gamma: float = 2.0):
    """Pure-JAX reference mirroring the PyTorch module (reduction='mean')."""
    output = output.astype(jnp.float32)
    n = output.shape[0]
    tgt_logit = output[jnp.arange(n), target]
    probs = jax.nn.sigmoid(tgt_logit)
    focal_w = (1.0 - probs) ** gamma
    lse = jax.scipy.special.logsumexp(output, axis=-1)
    ce = lse - tgt_logit
    return jnp.sum(focal_w * ce / jnp.sum(focal_w))


if __name__ == "__main__":
    key = jax.random.PRNGKey(0)
    k1, k2, k3, k4 = jax.random.split(key, 4)

    # Case 1: seq=8 samples, 32 classes, f32 (single-tile / single-partition path).
    N1, C1 = 8, 32
    logits1 = jax.random.normal(k1, (N1, C1), dtype=jnp.float32)
    target1 = jax.random.randint(k2, (N1,), 0, C1, dtype=jnp.int32)
    loss1 = jax.block_until_ready(focal_loss_pallas(logits1, target1, gamma=2.0))
    ref1 = focal_loss_ref(logits1, target1, gamma=2.0)
    assert jnp.allclose(loss1, ref1, rtol=1e-5, atol=1e-5), (loss1, ref1)

    # Case 2: bf16 logits (streamed without wrapper upcast), multi-tile,
    # 2-way parallel split, ragged last tile + clamped/masked duplicate block.
    N2, C2 = 40, 32
    logits2 = jax.random.normal(k3, (N2, C2), dtype=jnp.float32).astype(jnp.bfloat16)
    target2 = jax.random.randint(k4, (N2,), 0, C2, dtype=jnp.int32)
    loss2 = jax.block_until_ready(
        focal_loss_pallas(logits2, target2, gamma=2.0, tile_rows=16))
    ref2 = focal_loss_ref(logits2, target2, gamma=2.0)
    assert jnp.allclose(loss2, ref2, rtol=1e-4, atol=1e-4), (loss2, ref2)

    print("KERNEL_OK")
</pallas_src>

<mosaic_0001>
module attributes {stable_mosaic.version = 11 : i64} {
  func.func @_focal_loss_kernel(%arg0: i32, %arg1: i32, %arg2: memref<8x32xf32, #tpu.memory_space<vmem>>, %arg3: memref<8x1xi32, #tpu.memory_space<vmem>>, %arg4: memref<1x1xf32, #tpu.memory_space<vmem>>, %arg5: memref<1x1xf32, #tpu.memory_space<vmem>>, %arg6: memref<8x1xf32, #tpu.memory_space<vmem>>, %arg7: memref<8x1xf32, #tpu.memory_space<vmem>>) attributes {dimension_semantics = [#tpu.dimension_semantics<parallel>, #tpu.dimension_semantics<arbitrary>], iteration_bounds = array<i64: 1, 1>, scalar_prefetch = 0 : i64, scratch_operands = 2 : i64, tpu.core_type = #tpu.core_type<tc>, window_params = [{transform_indices = @transform_0, window_bounds = array<i64: 8, 32>}, {transform_indices = @transform_1, window_bounds = array<i64: 8, 1>}, {transform_indices = @transform_2, window_bounds = array<i64: 1, 1>}, {transform_indices = @transform_3, window_bounds = array<i64: 1, 1>}]} {
    %c0_i32 = arith.constant 0 : i32
    %0 = arith.cmpi eq, %arg1, %c0_i32 : i32
    %1 = arith.extui %0 : i1 to i32
    %c0_i32_0 = arith.constant 0 : i32
    %2 = arith.cmpi ne, %1, %c0_i32_0 : i32
    scf.if %2 {
      %cst_22 = arith.constant 0.000000e+00 : f32
      %52 = vector.broadcast %cst_22 : f32 to vector<8x1xf32>
      %c0_23 = arith.constant 0 : index
      %c0_24 = arith.constant 0 : index
      %53 = vector.load %arg6[%c0_23, %c0_24] : memref<8x1xf32, #tpu.memory_space<vmem>>, vector<8x1xf32>
      tpu.vector_store %arg6[%c0_23, %c0_24], %52 {strides = array<i32>} : memref<8x1xf32, #tpu.memory_space<vmem>>, vector<8x1xf32>,
      %cst_25 = arith.constant 0.000000e+00 : f32
      %54 = vector.broadcast %cst_25 : f32 to vector<8x1xf32>
      %c0_26 = arith.constant 0 : index
      %c0_27 = arith.constant 0 : index
      %55 = vector.load %arg7[%c0_26, %c0_27] : memref<8x1xf32, #tpu.memory_space<vmem>>, vector<8x1xf32>
      tpu.vector_store %arg7[%c0_26, %c0_27], %54 {strides = array<i32>} : memref<8x1xf32, #tpu.memory_space<vmem>>, vector<8x1xf32>,
    } else {
    }
    %c0 = arith.constant 0 : index
    %c0_1 = arith.constant 0 : index
    %3 = vector.load %arg2[%c0, %c0_1] : memref<8x32xf32, #tpu.memory_space<vmem>>, vector<8x32xf32>
    %c0_2 = arith.constant 0 : index
    %c0_3 = arith.constant 0 : index
    %4 = vector.load %arg3[%c0_2, %c0_3] : memref<8x1xi32, #tpu.memory_space<vmem>>, vector<8x1xi32>
    %5 = tpu.iota {dimensions = array<i32: 1>} : vector<8x32xi32>
    %6 = vector.broadcast %4 : vector<8x1xi32> to vector<8x32xi32>
    %7 = arith.cmpi eq, %5, %6 : vector<8x32xi32>
    %cst = arith.constant 0.000000e+00 : f32
    %8 = vector.broadcast %cst : f32 to vector<8x32xf32>
    %9 = arith.select %7, %3, %8 : vector<8x32xi1>, vector<8x32xf32>
    %cst_4 = arith.constant dense<0.000000e+00> : vector<8xf32>
    %10 = vector.multi_reduction <add>, %9, %cst_4 [1] : vector<8x32xf32> to vector<8xf32>
    %11 = vector.shape_cast %10 : vector<8xf32> to vector<8x1xf32>
    %cst_5 = arith.constant dense<0xFF800000> : vector<8xf32>
    %12 = vector.multi_reduction <maximumf>, %3, %cst_5 [1] : vector<8x32xf32> to vector<8xf32>
    %13 = vector.shape_cast %12 : vector<8xf32> to vector<8x1xf32>
    %14 = vector.broadcast %13 : vector<8x1xf32> to vector<8x32xf32>
    %15 = arith.subf %3, %14 : vector<8x32xf32>
    %16 = math.exp %15 : vector<8x32xf32>
    %cst_6 = arith.constant dense<0.000000e+00> : vector<8xf32>
    %17 = vector.multi_reduction <add>, %16, %cst_6 [1] : vector<8x32xf32> to vector<8xf32>
    %18 = vector.shape_cast %17 : vector<8xf32> to vector<8x1xf32>
    %19 = math.log %18 : vector<8x1xf32>
    %20 = arith.addf %19, %13 : vector<8x1xf32>
    %21 = arith.subf %20, %11 : vector<8x1xf32>
    %22 = arith.negf %11 : vector<8x1xf32>
    %23 = math.exp %22 : vector<8x1xf32>
    %cst_7 = arith.constant 1.000000e+00 : f32
    %24 = vector.broadcast %cst_7 : f32 to vector<8x1xf32>
    %25 = arith.addf %24, %23 : vector<8x1xf32>
    %26 = arith.divf %24, %25 : vector<8x1xf32>
    %cst_8 = arith.constant 1.000000e+00 : f32
    %27 = vector.broadcast %cst_8 : f32 to vector<8x1xf32>
    %28 = arith.subf %27, %26 : vector<8x1xf32>
    %29 = arith.mulf %28, %28 : vector<8x1xf32>
    %30 = arith.mulf %29, %21 : vector<8x1xf32>
    %c1_i32 = arith.constant 1 : i32
    %31 = arith.muli %arg0, %c1_i32 : i32
    %32 = arith.addi %31, %arg1 : i32
    %c8_i32 = arith.constant 8 : i32
    %33 = arith.muli %32, %c8_i32 : i32
    %34 = tpu.iota {dimensions = array<i32: 0>} : vector<8x1xi32>
    %35 = vector.broadcast %33 : i32 to vector<8x1xi32>
    %36 = arith.addi %35, %34 : vector<8x1xi32>
    %c8_i32_9 = arith.constant 8 : i32
    %37 = vector.broadcast %c8_i32_9 : i32 to vector<8x1xi32>
    %38 = arith.cmpi slt, %36, %37 : vector<8x1xi32>
    %cst_10 = arith.constant 0.000000e+00 : f32
    %39 = vector.broadcast %cst_10 : f32 to vector<8x1xf32>
    %40 = arith.select %38, %30, %39 : vector<8x1xi1>, vector<8x1xf32>
    %cst_11 = arith.constant 0.000000e+00 : f32
    %41 = vector.broadcast %cst_11 : f32 to vector<8x1xf32>
    %42 = arith.select %38, %29, %41 : vector<8x1xi1>, vector<8x1xf32>
    %c0_12 = arith.constant 0 : index
    %c0_13 = arith.constant 0 : index
    %43 = vector.load %arg6[%c0_12, %c0_13] : memref<8x1xf32, #tpu.memory_space<vmem>>, vector<8x1xf32>
    %44 = arith.addf %43, %40 : vector<8x1xf32>
    %c0_14 = arith.constant 0 : index
    %c0_15 = arith.constant 0 : index
    %45 = vector.load %arg6[%c0_14, %c0_15] : memref<8x1xf32, #tpu.memory_space<vmem>>, vector<8x1xf32>
    tpu.vector_store %arg6[%c0_14, %c0_15], %44 {strides = array<i32>} : memref<8x1xf32, #tpu.memory_space<vmem>>, vector<8x1xf32>,
    %c0_16 = arith.constant 0 : index
    %c0_17 = arith.constant 0 : index
    %46 = vector.load %arg7[%c0_16, %c0_17] : memref<8x1xf32, #tpu.memory_space<vmem>>, vector<8x1xf32>
    %47 = arith.addf %46, %42 : vector<8x1xf32>
    %c0_18 = arith.constant 0 : index
    %c0_19 = arith.constant 0 : index
    %48 = vector.load %arg7[%c0_18, %c0_19] : memref<8x1xf32, #tpu.memory_space<vmem>>, vector<8x1xf32>
    tpu.vector_store %arg7[%c0_18, %c0_19], %47 {strides = array<i32>} : memref<8x1xf32, #tpu.memory_space<vmem>>, vector<8x1xf32>,
    %c0_i32_20 = arith.constant 0 : i32
    %49 = arith.cmpi eq, %arg1, %c0_i32_20 : i32
    %50 = arith.extui %49 : i1 to i32
    %c0_i32_21 = arith.constant 0 : i32
    %51 = arith.cmpi ne, %50, %c0_i32_21 : i32
    scf.if %51 {
      %c0_22 = arith.constant 0 : index
      %c0_23 = arith.constant 0 : index
      %52 = vector.load %arg6[%c0_22, %c0_23] : memref<8x1xf32, #tpu.memory_space<vmem>>, vector<8x1xf32>
      %cst_24 = arith.constant dense<0.000000e+00> : vector<1xf32>
      %53 = vector.multi_reduction <add>, %52, %cst_24 [0] : vector<8x1xf32> to vector<1xf32>
      %54 = vector.shape_cast %53 : vector<1xf32> to vector<1x1xf32>
      %c0_25 = arith.constant 0 : index
      %c0_26 = arith.constant 0 : index
      %55 = vector.load %arg4[%c0_25, %c0_26] : memref<1x1xf32, #tpu.memory_space<vmem>>, vector<1x1xf32>
      tpu.vector_store %arg4[%c0_25, %c0_26], %54 {strides = array<i32>} : memref<1x1xf32, #tpu.memory_space<vmem>>, vector<1x1xf32>,
      %c0_27 = arith.constant 0 : index
      %c0_28 = arith.constant 0 : index
      %56 = vector.load %arg7[%c0_27, %c0_28] : memref<8x1xf32, #tpu.memory_space<vmem>>, vector<8x1xf32>
      %cst_29 = arith.constant dense<0.000000e+00> : vector<1xf32>
      %57 = vector.multi_reduction <add>, %56, %cst_29 [0] : vector<8x1xf32> to vector<1xf32>
      %58 = vector.shape_cast %57 : vector<1xf32> to vector<1x1xf32>
      %c0_30 = arith.constant 0 : index
      %c0_31 = arith.constant 0 : index
      %59 = vector.load %arg5[%c0_30, %c0_31] : memref<1x1xf32, #tpu.memory_space<vmem>>, vector<1x1xf32>
      tpu.vector_store %arg5[%c0_30, %c0_31], %58 {strides = array<i32>} : memref<1x1xf32, #tpu.memory_space<vmem>>, vector<1x1xf32>,
    } else {
    }
    return
  }
  func.func @transform_0(%arg0: i32, %arg1: i32) -> (i32, i32) {
    %c1_i32 = arith.constant 1 : i32
    %0 = arith.muli %arg0, %c1_i32 : i32
    %1 = arith.addi %0, %arg1 : i32
    %c0_i32 = arith.constant 0 : i32
    %2 = arith.minsi %1, %c0_i32 : i32
    %c0_i32_0 = arith.constant 0 : i32
    %c0_i32_1 = arith.constant 0 : i32
    return %2, %c0_i32_0 : i32, i32
  }
  func.func @transform_1(%arg0: i32, %arg1: i32) -> (i32, i32) {
    %c1_i32 = arith.constant 1 : i32
    %0 = arith.muli %arg0, %c1_i32 : i32
    %1 = arith.addi %0, %arg1 : i32
    %c0_i32 = arith.constant 0 : i32
    %2 = arith.minsi %1, %c0_i32 : i32
    %c0_i32_0 = arith.constant 0 : i32
    %c0_i32_1 = arith.constant 0 : i32
    return %2, %c0_i32_0 : i32, i32
  }
  func.func @transform_2(%arg0: i32, %arg1: i32) -> (i32, i32) {
    %c0_i32 = arith.constant 0 : i32
    %c0_i32_0 = arith.constant 0 : i32
    return %arg0, %c0_i32 : i32, i32
  }
  func.func @transform_3(%arg0: i32, %arg1: i32) -> (i32, i32) {
    %c0_i32 = arith.constant 0 : i32
    %c0_i32_0 = arith.constant 0 : i32
    return %arg0, %c0_i32 : i32, i32
  }
}

</mosaic_0001>

<bundles_post_ra>
// kernel: tpu_custom_call.1
= control target key start
LH: loop header
LB: loop body
LE: loop exit
PB: predicated region body
PF: predicated region fallthrough
CT: control target
= control target key end

     0   :  { %9 = vsyncpa [#allocation5], 0  ;;  %vm85_vm0 = vcmask 261120   ;;  %s324_s0 = inlined_call_operand.vmem [shape: f32[8,32], index: 0, kind: input, shape index: {}]   ;;  %s325_s1 = inlined_call_operand.vmem [shape: s32[8,1], index: 1, kind: input, shape index: {}]   ;;  %s326_s2 = inlined_call_operand.hbm [shape: f32[1,1], index: 2, kind: output, shape index: {0}]   ;;  %s327_s3 = inlined_call_operand.hbm [shape: f32[1,1], index: 3, kind: output, shape index: {1}]  }
   0x1   :  { %v76_v0 = vld [vmem:[%s324_s0] sm:$0xff] }
   0x2   :  { %10 = vsyncpa [#allocation7], 0  ;;  %v89_v1 = vsel %vm85_vm0, %v76_v0, -inf  ;;  %v251_v2 = vmov 0   ;;  %v77_v3 = vld [vmem:[%s325_s1] sm:$0xff]  ;;  %v78_v6 = vlaneseq  ;;  %vm73_vm2 = vcmask 7168  }
   0x3   :  { %194 = vset.pattern.permute.xlu0 %v251_v2  ;;  %v252_v14 = vmov 0.0   ;;  %s253_s0 = smov [#allocation6]   ;;  %vm138_vm3 = vcmask 0   ;;  %s254_s16 = smov [#allocation4]  }
   0x4   :  { %90 = vmax.xlane.f32.xlu0 %v89_v1  ;;  %v79_v8 = vand.u32 127, %v78_v6  ;;  %75 = vst.msk [vmem:[#allocation3] sm:$0xff] %vm73_vm2, %v252_v14  ;;  %74 = vst.msk [vmem:[#allocation2] sm:$0xff] %vm73_vm2, %v252_v14  ;;  %s165_s1 = sshll.u32 %s253_s0, 4  ;;  %s155_s17 = sshll.u32 %s254_s16, 4  ;;  %s166_s1 = int_to_ptr.vmem [resolvable:$true] %s165_s1  ;;  %s290_s17 = int_to_ptr.vmem [resolvable:$true] %s155_s17 }
   0x5   :  { %s203_s18 = scalar_lea.vmem %s166_s1, 16  ;;  %s207_s19 = scalar_lea.vmem %s166_s1, 32 }
   0x6   :  { %p204_p0 = scmp.ne.s32.totalorder %s166_s1, %s203_s18  ;;  %p208_p1 = scmp.lt.s32.totalorder %s166_s1, %s166_s1 }
   0x7   :  { %p209_p2 = scmp.lt.s32.totalorder %s207_s19, %s203_s18 }
   0x9   :  { %p210_p3 = por %p209_p2, %p208_p1 }
   0xb   :  { %v124_v25 = vld [vmem:[#allocation3] sm:$0xff]  ;;  %v120_v28 = vld [vmem:[#allocation2] sm:$0xff]  ;;  %p211_p4 = pnand %p210_p3, %p204_p0 }
  0x1a   :  { %81 = vperm.xlu0 %194, %v77_v3  }
  0x91   :  { %v91_v4 = vpop.xlane.xlu0 %90 }
  0x92   :  { %v92_v5 = vsub.f32 %v76_v0, %v91_v4 }
  0x94   :  { %v93_v7 = vmul.f32 1.442695, %v92_v5 }
  0x96   :  { %195 = vpow2.f32 %v93_v7 }
  0x99   :  { %v82_v9 = vpop.permute.xlu0 %81 }
  0x9a   :  { %vm83_vm1 = vcmp.eq.s32.totalorder %v79_v8, %v82_v9 }
  0x9b   :  { %v84_v10 = vsel %vm83_vm1, %v76_v0, 0.0 }
  0x9c   :  { %v86_v11 = vsel %vm85_vm0, %v84_v10, 0.0 }
  0x9d   :  { %87 = vadd.xlane.f32.xlu1 %v86_v11 }
  0xa0   :  { %v196_v12 = vpop.eup %195 }
  0xa1   :  { %v95_v13 = vsel %vm85_vm0, %v196_v12, 0.0 }
  0xa2   :  { %96 = vadd.xlane.f32.xlu1 %v95_v13 }
 0x12a   :  { %v88_v15 = vpop.xlane.xlu1 %87 }
 0x12b   :  { %v189_v16 = vmul.f32 -1.442695, %v88_v15 }
 0x12d   :  { %197 = vpow2.f32 %v189_v16 }
 0x12f   :  { %v97_v17 = vpop.xlane.xlu1 %96 }
 0x130   :  { %199 = vlog2.f32 %v97_v17 }
 0x137   :  { %v198_v18 = vpop.eup %197 }
 0x138   :  { %v105_v19 = vadd.f32 1.0, %v198_v18 }
 0x13a   :  { %201 = vrcp.f32 %v105_v19  ;;  %v200_v20 = vpop.eup %199 }
 0x13b   :  { %v99_v21 = vmul.f32 0.6931472, %v200_v20 }
 0x13d   :  { %v100_v22 = vadd.f32 %v99_v21, %v91_v4 }
 0x13f   :  { %v101_v27 = vsub.f32 %v100_v22, %v88_v15 }
 0x144   :  { %v202_v23 = vpop.eup %201 }
 0x145   :  { %v108_v24 = vsub.f32 1.0, %v202_v23 }
 0x147   :  { %v109_v26 = vmul.f32 %v108_v24, %v108_v24 }
 0x149   :  { %v125_v29 = vadd.f32 %v124_v25, %v109_v26  ;;  %v110_v30 = vmul.f32 %v109_v26, %v101_v27 }
 0x14b   :  { %126 = vst.msk [vmem:[#allocation3] sm:$0xff] %vm73_vm2, %v125_v29  ;;  %v121_v31 = vadd.f32 %v120_v28, %v110_v30 }
 0x14d   :  { %123 = vst.msk [vmem:[#allocation2] sm:$0xff] %vm73_vm2, %v121_v31 }
 0x152   :  { %v140_v32 = vld [vmem:[#allocation3] sm:$0xff] }
 0x153   :  { %v141_v33 = vsel %vm73_vm2, %v140_v32, 0.0 }
 0x154   :  { %v130_v34 = vld [vmem:[#allocation2] sm:$0xff]  ;;  %v142_v35 = vrot.slane %v141_v33, 4 }
 0x155   :  { %v131_v36 = vsel %vm73_vm2, %v130_v34, 0.0 }
 0x156   :  { %v132_v37 = vrot.slane %v131_v36, 4  ;;  %v143_v38 = vadd.f32 %v142_v35, %v141_v33 }
 0x158   :  { %v133_v39 = vadd.f32 %v132_v37, %v131_v36  ;;  %v144_v40 = vrot.slane %v143_v38, 2 }
 0x15a   :  { %v134_v41 = vrot.slane %v133_v39, 2  ;;  %v145_v42 = vadd.f32 %v144_v40, %v143_v38 }
 0x15c   :  { %v135_v43 = vadd.f32 %v134_v41, %v133_v39  ;;  %v146_v44 = vrot.slane %v145_v42, 1 }
 0x15e   :  { %v136_v45 = vrot.slane %v135_v43, 1  ;;  %v147_v46 = vadd.f32 %v146_v44, %v145_v42 }
 0x160   :  { %v137_v47 = vadd.f32 %v136_v45, %v135_v43  ;;  %148 = vst.msk [vmem:[#allocation6] sm:$0x1] %vm138_vm3, %v147_v46 }
 0x161   :  { %214 = shalt.err (!%p211_p4)
}
 0x162   :  { %s215_s22 = scalar_lea.hbm %s327_s3, 16 }
 0x163   :  { %p216_p5 = scmp.ne.s32.totalorder %s327_s3, %s215_s22  ;;  %p219_p6 = scmp.lt.u32.totalorder %s215_s22, %s327_s3 }
 0x165   :  { %p221_p7 = pnand %p219_p6, %p216_p5 }
 0x167   :  { %224 = shalt.err (!%p221_p7)
}
 0x168   :  { %168 = dma.vmem_to_hbm [thread:$0]  %s166_s1, 16, %s327_s3, [#allocation7]   ;;  %139 = vst.msk [vmem:[#allocation4] sm:$0x1] %vm138_vm3, %v137_v47 }
 0x169   :  { %s225_s29 = scalar_lea.vmem %s290_s17, 16  ;;  %s229_s30 = scalar_lea.vmem %s290_s17, 32 }
 0x16a   :  { %p226_p8 = scmp.ne.s32.totalorder %s290_s17, %s225_s29  ;;  %p230_p9 = scmp.lt.s32.totalorder %s290_s17, %s290_s17 }
 0x16b   :  { %p231_p10 = scmp.lt.s32.totalorder %s229_s30, %s225_s29 }
 0x16d   :  { %p232_p11 = por %p231_p10, %p230_p9 }
 0x16f   :  { %p233_p12 = pnand %p232_p11, %p226_p8 }
 0x171   :  { %236 = shalt.err (!%p233_p12)
}
 0x172   :  { %s237_s6 = scalar_lea.hbm %s326_s2, 16 }
 0x173   :  { %p238_p13 = scmp.ne.s32.totalorder %s326_s2, %s237_s6  ;;  %p241_p0 = scmp.lt.u32.totalorder %s237_s6, %s326_s2 }
 0x175   :  { %p243_p1 = pnand %p241_p0, %p238_p13 }
 0x177   :  { %246 = shalt.err (!%p243_p1)
}
 0x178   :  { %158 = dma.vmem_to_hbm [thread:$0]  %s290_s17, 16, %s326_s2, [#allocation5]  }
 0x179   :  { %247 = dma.done.wait [#allocation5], 16  }
 0x17a   :  { %248 = vsyncadd [#allocation5], 4294967280 }
 0x17b   :  { %249 = dma.done.wait [#allocation7], 16  }
 0x17c   :  { %250 = vsyncadd [#allocation7], 4294967280 }
 0x17d   :  { %175 = vsyncpa [#allocation5], 1 }
 0x17e   :  { %176 = vsyncpa [#allocation7], 1 }

</bundles_post_ra>
